<compile_context>
chip_gen: v7x
topology: tpu7x:2x2x1
jax: 0.10.0
libtpu: 0.0.40
codegen_flags: <defaults>
</compile_context>

<pallas_src>
import functools

import jax
import jax.numpy as jnp
from jax.experimental import pallas as pl
from jax.experimental.pallas import tpu as pltpu


MAX_TB = 1024             # upper bound on batch tile rows (sweep 512-1024)
MIN_GRID_STEPS = 2        # keep >=2 steps when B >= 16 so v7x dual TCs share work
ACT_VMEM_BUDGET = 24 << 20  # budget for double-buffered (TB, D) in+out blocks
LANE_PAD = 128            # pad hidden widths to full lanes


def _round_up(x, mult):
    return ((x + mult - 1) // mult) * mult


# --------------------------------------------------------------------------
# Kernel
# --------------------------------------------------------------------------
def _npi_kernel(*refs, num_subtiles, sub_rows):
    """One batch tile of the NPI MLP forward.

    refs = (x_ref, w1, b1, ..., w9, b9, out_ref).  The tile's rows are split
    into `num_subtiles` independent chains so the LLO scheduler can overlap one
    chain's MXU pushes with the other's result pop + bias/ReLU.
    """
    x_ref = refs[0]
    out_ref = refs[-1]
    param_refs = refs[1:-1]
    n_layers = len(param_refs) // 2

    # Independent row sub-tiles (static slices -> no runtime cost).
    subs = [x_ref[pl.ds(s * sub_rows, sub_rows), :] for s in range(num_subtiles)]

    for j in range(n_layers):
        w = param_refs[2 * j][...]          # (din_p, dout_p) bf16, VMEM-resident
        bias = param_refs[2 * j + 1][...]   # (1, dout_p) f32
        last = j == n_layers - 1
        for s in range(num_subtiles):
            # bf16 operands -> native MXU path; accumulate in f32, bias in f32.
            h = jnp.dot(subs[s].astype(jnp.bfloat16), w,
                        preferred_element_type=jnp.float32) + bias
            subs[s] = h if last else jnp.maximum(h, 0.0)   # ReLU on VPU (f32)

    for s in range(num_subtiles):
        out_ref[pl.ds(s * sub_rows, sub_rows), :] = subs[s].astype(out_ref.dtype)


# --------------------------------------------------------------------------
# Parameters
# --------------------------------------------------------------------------
def npi_layer_dims(n, m, k):
    d = n * m * k
    fact1, fact2, fact3 = 2 ** 2, 2 ** 3, 2 ** 3
    return [
        (d, n // fact1),           # first_linear
        (n // fact1, n // fact1),  # second_linear
        (n // fact1, n // fact2),  # third_linear
        (n // fact2, n // fact2),  # fourth_linear
        (n // fact2, n // fact3),  # fourth_linear_residual (sequential, no skip)
        (n // fact3, n // fact2),  # fifth_linear
        (n // fact2, n // fact1),  # sixth_linear
        (n // fact1, n // fact1),  # seventh_linear
        (n // fact1, d),           # last_linear (no ReLU)
    ]


def make_raw_params(key, n, m, k):
    """Unpadded f32 parameters matching the nn.Linear shapes (uniform init)."""
    raw = []
    for (din, dout) in npi_layer_dims(n, m, k):
        key, kw, kb = jax.random.split(key, 3)
        scale = 1.0 / jnp.sqrt(jnp.float32(din))
        w = jax.random.uniform(kw, (din, dout), jnp.float32, -scale, scale)
        b = jax.random.uniform(kb, (dout,), jnp.float32, -scale, scale)
        raw.append((w, b))
    return raw


def pack_kernel_params(raw, lane_pad=LANE_PAD):
    """Kernel parameter layout: weights (in, out) bf16, biases (1, out) f32.

    Hidden (inner) widths are zero-padded up to `lane_pad` lanes; the first
    input width and the final output width stay exact.  Zero pad rows/cols and
    zero pad-bias entries keep the math identical (ReLU keeps padded lanes 0).
    """
    dims = [(w.shape[0], w.shape[1]) for (w, _) in raw]
    widths = ([dims[0][0]]
              + [_round_up(dout, lane_pad) for (_, dout) in dims[:-1]]
              + [dims[-1][1]])
    params = []
    for j, (w, bias) in enumerate(raw):
        din, dout = dims[j]
        din_p, dout_p = widths[j], widths[j + 1]
        w_p = jnp.zeros((din_p, dout_p), jnp.float32).at[:din, :dout].set(w)
        b_p = jnp.zeros((1, dout_p), jnp.float32).at[0, :dout].set(bias)
        params += [w_p.astype(jnp.bfloat16), b_p]
    return params


# --------------------------------------------------------------------------
# Wrapper
# --------------------------------------------------------------------------
def _choose_batch_tile(b, d, in_itemsize, out_itemsize):
    """Pick (batch_tile, num_subtiles) given VMEM and multi-core constraints."""
    if b < 16:
        # Tiny batch: one grid step, full-array block (legal even if b < 8);
        # splitting further would only add launch overhead.
        return b, 1

    # D-aware VMEM clamp: double-buffered (tb, d) input + output blocks.
    act_bytes_per_row = 2 * d * in_itemsize + 2 * d * out_itemsize
    tb_cap = max(8, (ACT_VMEM_BUDGET // act_bytes_per_row) // 8 * 8)
    max_tb = max(8, min(MAX_TB, tb_cap))

    # Balanced tiles; keep >= MIN_GRID_STEPS steps for v7x's two TensorCores.
    num_tiles = max(pl.cdiv(b, max_tb), MIN_GRID_STEPS)
    tb = min(max_tb, _round_up(pl.cdiv(b, num_tiles), 8))
    tb = max(tb, 8)

    # Two independent row sub-chains hide MXU fill/drain of the small matmuls.
    num_subtiles = 2 if (tb >= 16 and tb % 16 == 0) else 1
    return tb, num_subtiles


def npi_forward(orig_activs, params, *, out_dtype=jnp.float32):
    """orig_activs: (b, n, m, k) float32.  Returns (b, n, m, k) out_dtype."""
    b, n, m, k = orig_activs.shape
    d = n * m * k
    # bf16 activations into HBM->VMEM DMA: the kernel downcasts before every
    # dot anyway, so f32 input would be ~25% wasted HBM traffic.
    x2d = orig_activs.reshape(b, d).astype(jnp.bfloat16)

    out_itemsize = jnp.dtype(out_dtype).itemsize
    tb, num_subtiles = _choose_batch_tile(b, d, x2d.dtype.itemsize, out_itemsize)
    b_pad = pl.cdiv(b, tb) * tb
    if b_pad != b:
        x2d = jnp.pad(x2d, ((0, b_pad - b), (0, 0)))
    grid = (b_pad // tb,)

    x_spec = pl.BlockSpec((tb, d), lambda i: (i, 0))
    out_spec = pl.BlockSpec((tb, d), lambda i: (i, 0))
    # Constant index_map -> weights/biases DMA'd once, VMEM-resident all steps.
    param_specs = [pl.BlockSpec(p.shape, lambda i: (0, 0)) for p in params]

    n_layers = len(params) // 2
    flops = 2 * b_pad * sum(int(params[2 * j].shape[0]) * int(params[2 * j].shape[1])
                            for j in range(n_layers))
    param_bytes = sum(int(p.size) * p.dtype.itemsize for p in params)
    bytes_accessed = param_bytes + b_pad * d * (x2d.dtype.itemsize + out_itemsize)

    # Explicit VMEM budget: params + double-buffered in/out tiles + margin.
    act_bytes = tb * d * (2 * x2d.dtype.itemsize + 2 * out_itemsize)
    vmem_limit = int(min(64 << 20, max(32 << 20, param_bytes + act_bytes + (4 << 20))))

    kernel = functools.partial(_npi_kernel,
                               num_subtiles=num_subtiles,
                               sub_rows=tb // num_subtiles)

    out2d = pl.pallas_call(
        kernel,
        out_shape=jax.ShapeDtypeStruct((b_pad, d), out_dtype),
        grid=grid,
        in_specs=[x_spec] + param_specs,
        out_specs=out_spec,
        compiler_params=pltpu.CompilerParams(
            dimension_semantics=("parallel",),
            vmem_limit_bytes=vmem_limit),
        cost_estimate=pl.CostEstimate(
            flops=flops, transcendentals=0, bytes_accessed=bytes_accessed),
    )(x2d, *params)

    if b_pad != b:
        out2d = out2d[:b]
    return out2d.reshape(b, n, m, k)


# --------------------------------------------------------------------------
# Pure-JAX reference (unpadded weights, same bf16 cast discipline)
# --------------------------------------------------------------------------
def npi_forward_ref(orig_activs, raw_params):
    b, n, m, k = orig_activs.shape
    d = n * m * k
    h = orig_activs.reshape(b, d)
    n_layers = len(raw_params)
    for j, (w, bias) in enumerate(raw_params):
        h = jnp.dot(h.astype(jnp.bfloat16), w.astype(jnp.bfloat16),
                    preferred_element_type=jnp.float32) + bias
        if j != n_layers - 1:
            h = jnp.maximum(h, 0.0)
    return h.reshape(b, n, m, k)


if __name__ == "__main__":
    # Small shapes consistent with the module: (b, n, m, k) with k == 1.
    N, M, K = 128, 4, 1          # flattened feature dim D = 512, hidden 32 / 16

    key = jax.random.PRNGKey(0)
    key_x, key_p, key_x2 = jax.random.split(key, 3)
    raw_params = make_raw_params(key_p, N, M, K)
    params = pack_kernel_params(raw_params)

    fwd = jax.jit(npi_forward)

    # Case 1: tiny batch (single grid step, full-array block).
    B = 4
    x = jax.random.normal(key_x, (B, N, M, K), dtype=jnp.float32)
    out = jax.block_until_ready(fwd(x, params))
    assert out.shape == (B, N, M, K), out.shape
    assert out.dtype == jnp.float32
    ref = jax.block_until_ready(npi_forward_ref(x, raw_params))
    assert jnp.allclose(out, ref, rtol=1e-2, atol=1e-3), \
        float(jnp.max(jnp.abs(out - ref)))

    # Case 2: exercises multi-step grid, row sub-tiles and batch padding.
    B2 = 20
    x2 = jax.random.normal(key_x2, (B2, N, M, K), dtype=jnp.float32)
    out2 = jax.block_until_ready(fwd(x2, params))
    ref2 = jax.block_until_ready(npi_forward_ref(x2, raw_params))
    assert out2.shape == (B2, N, M, K)
    assert jnp.allclose(out2, ref2, rtol=1e-2, atol=1e-3), \
        float(jnp.max(jnp.abs(out2 - ref2)))

    print("KERNEL_OK")
</pallas_src>

<mosaic_0001>
module attributes {stable_mosaic.version = 11 : i64} {
  func.func @_npi_kernel(%arg0: i32, %arg1: memref<4x512xbf16, #tpu.memory_space<vmem>>, %arg2: memref<512x128xbf16, #tpu.memory_space<vmem>>, %arg3: memref<1x128xf32, #tpu.memory_space<vmem>>, %arg4: memref<128x128xbf16, #tpu.memory_space<vmem>>, %arg5: memref<1x128xf32, #tpu.memory_space<vmem>>, %arg6: memref<128x128xbf16, #tpu.memory_space<vmem>>, %arg7: memref<1x128xf32, #tpu.memory_space<vmem>>, %arg8: memref<128x128xbf16, #tpu.memory_space<vmem>>, %arg9: memref<1x128xf32, #tpu.memory_space<vmem>>, %arg10: memref<128x128xbf16, #tpu.memory_space<vmem>>, %arg11: memref<1x128xf32, #tpu.memory_space<vmem>>, %arg12: memref<128x128xbf16, #tpu.memory_space<vmem>>, %arg13: memref<1x128xf32, #tpu.memory_space<vmem>>, %arg14: memref<128x128xbf16, #tpu.memory_space<vmem>>, %arg15: memref<1x128xf32, #tpu.memory_space<vmem>>, %arg16: memref<128x128xbf16, #tpu.memory_space<vmem>>, %arg17: memref<1x128xf32, #tpu.memory_space<vmem>>, %arg18: memref<128x512xbf16, #tpu.memory_space<vmem>>, %arg19: memref<1x512xf32, #tpu.memory_space<vmem>>, %arg20: memref<4x512xf32, #tpu.memory_space<vmem>>) attributes {dimension_semantics = [#tpu.dimension_semantics<parallel>], iteration_bounds = array<i64: 1>, scalar_prefetch = 0 : i64, scratch_operands = 0 : i64, tpu.core_type = #tpu.core_type<tc>, window_params = [{transform_indices = @transform_0, window_bounds = array<i64: 4, 512>}, {pipeline_mode = #tpu.pipeline_mode<synchronous>, transform_indices = @transform_1, window_bounds = array<i64: 512, 128>}, {pipeline_mode = #tpu.pipeline_mode<synchronous>, transform_indices = @transform_2, window_bounds = array<i64: 1, 128>}, {pipeline_mode = #tpu.pipeline_mode<synchronous>, transform_indices = @transform_3, window_bounds = array<i64: 128, 128>}, {pipeline_mode = #tpu.pipeline_mode<synchronous>, transform_indices = @transform_4, window_bounds = array<i64: 1, 128>}, {pipeline_mode = #tpu.pipeline_mode<synchronous>, transform_indices = @transform_5, window_bounds = array<i64: 128, 128>}, {pipeline_mode = #tpu.pipeline_mode<synchronous>, transform_indices = @transform_6, window_bounds = array<i64: 1, 128>}, {pipeline_mode = #tpu.pipeline_mode<synchronous>, transform_indices = @transform_7, window_bounds = array<i64: 128, 128>}, {pipeline_mode = #tpu.pipeline_mode<synchronous>, transform_indices = @transform_8, window_bounds = array<i64: 1, 128>}, {pipeline_mode = #tpu.pipeline_mode<synchronous>, transform_indices = @transform_9, window_bounds = array<i64: 128, 128>}, {pipeline_mode = #tpu.pipeline_mode<synchronous>, transform_indices = @transform_10, window_bounds = array<i64: 1, 128>}, {pipeline_mode = #tpu.pipeline_mode<synchronous>, transform_indices = @transform_11, window_bounds = array<i64: 128, 128>}, {pipeline_mode = #tpu.pipeline_mode<synchronous>, transform_indices = @transform_12, window_bounds = array<i64: 1, 128>}, {pipeline_mode = #tpu.pipeline_mode<synchronous>, transform_indices = @transform_13, window_bounds = array<i64: 128, 128>}, {pipeline_mode = #tpu.pipeline_mode<synchronous>, transform_indices = @transform_14, window_bounds = array<i64: 1, 128>}, {pipeline_mode = #tpu.pipeline_mode<synchronous>, transform_indices = @transform_15, window_bounds = array<i64: 128, 128>}, {pipeline_mode = #tpu.pipeline_mode<synchronous>, transform_indices = @transform_16, window_bounds = array<i64: 1, 128>}, {pipeline_mode = #tpu.pipeline_mode<synchronous>, transform_indices = @transform_17, window_bounds = array<i64: 128, 512>}, {pipeline_mode = #tpu.pipeline_mode<synchronous>, transform_indices = @transform_18, window_bounds = array<i64: 1, 512>}, {transform_indices = @transform_19, window_bounds = array<i64: 4, 512>}]} {
    %c0 = arith.constant 0 : index
    %c0_0 = arith.constant 0 : index
    %0 = vector.load %arg1[%c0, %c0_0] : memref<4x512xbf16, #tpu.memory_space<vmem>>, vector<4x512xbf16>
    %c0_1 = arith.constant 0 : index
    %c0_2 = arith.constant 0 : index
    %1 = vector.load %arg2[%c0_1, %c0_2] : memref<512x128xbf16, #tpu.memory_space<vmem>>, vector<512x128xbf16>
    %c0_3 = arith.constant 0 : index
    %c0_4 = arith.constant 0 : index
    %2 = vector.load %arg3[%c0_3, %c0_4] : memref<1x128xf32, #tpu.memory_space<vmem>>, vector<1x128xf32>
    %cst = arith.constant dense<0.000000e+00> : vector<4x128xf32>
    %3 = tpu.matmul %0, %1, %cst {dimension_numbers = #tpu.dot_dimension_numbers<[1], [0], [0], [1], [0, 0, 1, 1], [], []>} : vector<4x512xbf16>, vector<512x128xbf16>, vector<4x128xf32> -> vector<4x128xf32>
    %4 = vector.broadcast %2 : vector<1x128xf32> to vector<4x128xf32>
    %5 = arith.addf %3, %4 : vector<4x128xf32>
    %cst_5 = arith.constant 0.000000e+00 : f32
    %6 = vector.broadcast %cst_5 : f32 to vector<4x128xf32>
    %7 = arith.maximumf %5, %6 : vector<4x128xf32>
    %c0_6 = arith.constant 0 : index
    %c0_7 = arith.constant 0 : index
    %8 = vector.load %arg4[%c0_6, %c0_7] : memref<128x128xbf16, #tpu.memory_space<vmem>>, vector<128x128xbf16>
    %c0_8 = arith.constant 0 : index
    %c0_9 = arith.constant 0 : index
    %9 = vector.load %arg5[%c0_8, %c0_9] : memref<1x128xf32, #tpu.memory_space<vmem>>, vector<1x128xf32>
    %10 = arith.truncf %7 : vector<4x128xf32> to vector<4x128xbf16>
    %cst_10 = arith.constant dense<0.000000e+00> : vector<4x128xf32>
    %11 = tpu.matmul %10, %8, %cst_10 {dimension_numbers = #tpu.dot_dimension_numbers<[1], [0], [0], [1], [0, 0, 1, 1], [], []>} : vector<4x128xbf16>, vector<128x128xbf16>, vector<4x128xf32> -> vector<4x128xf32>
    %12 = vector.broadcast %9 : vector<1x128xf32> to vector<4x128xf32>
    %13 = arith.addf %11, %12 : vector<4x128xf32>
    %cst_11 = arith.constant 0.000000e+00 : f32
    %14 = vector.broadcast %cst_11 : f32 to vector<4x128xf32>
    %15 = arith.maximumf %13, %14 : vector<4x128xf32>
    %c0_12 = arith.constant 0 : index
    %c0_13 = arith.constant 0 : index
    %16 = vector.load %arg6[%c0_12, %c0_13] : memref<128x128xbf16, #tpu.memory_space<vmem>>, vector<128x128xbf16>
    %c0_14 = arith.constant 0 : index
    %c0_15 = arith.constant 0 : index
    %17 = vector.load %arg7[%c0_14, %c0_15] : memref<1x128xf32, #tpu.memory_space<vmem>>, vector<1x128xf32>
    %18 = arith.truncf %15 : vector<4x128xf32> to vector<4x128xbf16>
    %cst_16 = arith.constant dense<0.000000e+00> : vector<4x128xf32>
    %19 = tpu.matmul %18, %16, %cst_16 {dimension_numbers = #tpu.dot_dimension_numbers<[1], [0], [0], [1], [0, 0, 1, 1], [], []>} : vector<4x128xbf16>, vector<128x128xbf16>, vector<4x128xf32> -> vector<4x128xf32>
    %20 = vector.broadcast %17 : vector<1x128xf32> to vector<4x128xf32>
    %21 = arith.addf %19, %20 : vector<4x128xf32>
    %cst_17 = arith.constant 0.000000e+00 : f32
    %22 = vector.broadcast %cst_17 : f32 to vector<4x128xf32>
    %23 = arith.maximumf %21, %22 : vector<4x128xf32>
    %c0_18 = arith.constant 0 : index
    %c0_19 = arith.constant 0 : index
    %24 = vector.load %arg8[%c0_18, %c0_19] : memref<128x128xbf16, #tpu.memory_space<vmem>>, vector<128x128xbf16>
    %c0_20 = arith.constant 0 : index
    %c0_21 = arith.constant 0 : index
    %25 = vector.load %arg9[%c0_20, %c0_21] : memref<1x128xf32, #tpu.memory_space<vmem>>, vector<1x128xf32>
    %26 = arith.truncf %23 : vector<4x128xf32> to vector<4x128xbf16>
    %cst_22 = arith.constant dense<0.000000e+00> : vector<4x128xf32>
    %27 = tpu.matmul %26, %24, %cst_22 {dimension_numbers = #tpu.dot_dimension_numbers<[1], [0], [0], [1], [0, 0, 1, 1], [], []>} : vector<4x128xbf16>, vector<128x128xbf16>, vector<4x128xf32> -> vector<4x128xf32>
    %28 = vector.broadcast %25 : vector<1x128xf32> to vector<4x128xf32>
    %29 = arith.addf %27, %28 : vector<4x128xf32>
    %cst_23 = arith.constant 0.000000e+00 : f32
    %30 = vector.broadcast %cst_23 : f32 to vector<4x128xf32>
    %31 = arith.maximumf %29, %30 : vector<4x128xf32>
    %c0_24 = arith.constant 0 : index
    %c0_25 = arith.constant 0 : index
    %32 = vector.load %arg10[%c0_24, %c0_25] : memref<128x128xbf16, #tpu.memory_space<vmem>>, vector<128x128xbf16>
    %c0_26 = arith.constant 0 : index
    %c0_27 = arith.constant 0 : index
    %33 = vector.load %arg11[%c0_26, %c0_27] : memref<1x128xf32, #tpu.memory_space<vmem>>, vector<1x128xf32>
    %34 = arith.truncf %31 : vector<4x128xf32> to vector<4x128xbf16>
    %cst_28 = arith.constant dense<0.000000e+00> : vector<4x128xf32>
    %35 = tpu.matmul %34, %32, %cst_28 {dimension_numbers = #tpu.dot_dimension_numbers<[1], [0], [0], [1], [0, 0, 1, 1], [], []>} : vector<4x128xbf16>, vector<128x128xbf16>, vector<4x128xf32> -> vector<4x128xf32>
    %36 = vector.broadcast %33 : vector<1x128xf32> to vector<4x128xf32>
    %37 = arith.addf %35, %36 : vector<4x128xf32>
    %cst_29 = arith.constant 0.000000e+00 : f32
    %38 = vector.broadcast %cst_29 : f32 to vector<4x128xf32>
    %39 = arith.maximumf %37, %38 : vector<4x128xf32>
    %c0_30 = arith.constant 0 : index
    %c0_31 = arith.constant 0 : index
    %40 = vector.load %arg12[%c0_30, %c0_31] : memref<128x128xbf16, #tpu.memory_space<vmem>>, vector<128x128xbf16>
    %c0_32 = arith.constant 0 : index
    %c0_33 = arith.constant 0 : index
    %41 = vector.load %arg13[%c0_32, %c0_33] : memref<1x128xf32, #tpu.memory_space<vmem>>, vector<1x128xf32>
    %42 = arith.truncf %39 : vector<4x128xf32> to vector<4x128xbf16>
    %cst_34 = arith.constant dense<0.000000e+00> : vector<4x128xf32>
    %43 = tpu.matmul %42, %40, %cst_34 {dimension_numbers = #tpu.dot_dimension_numbers<[1], [0], [0], [1], [0, 0, 1, 1], [], []>} : vector<4x128xbf16>, vector<128x128xbf16>, vector<4x128xf32> -> vector<4x128xf32>
    %44 = vector.broadcast %41 : vector<1x128xf32> to vector<4x128xf32>
    %45 = arith.addf %43, %44 : vector<4x128xf32>
    %cst_35 = arith.constant 0.000000e+00 : f32
    %46 = vector.broadcast %cst_35 : f32 to vector<4x128xf32>
    %47 = arith.maximumf %45, %46 : vector<4x128xf32>
    %c0_36 = arith.constant 0 : index
    %c0_37 = arith.constant 0 : index
    %48 = vector.load %arg14[%c0_36, %c0_37] : memref<128x128xbf16, #tpu.memory_space<vmem>>, vector<128x128xbf16>
    %c0_38 = arith.constant 0 : index
    %c0_39 = arith.constant 0 : index
    %49 = vector.load %arg15[%c0_38, %c0_39] : memref<1x128xf32, #tpu.memory_space<vmem>>, vector<1x128xf32>
    %50 = arith.truncf %47 : vector<4x128xf32> to vector<4x128xbf16>
    %cst_40 = arith.constant dense<0.000000e+00> : vector<4x128xf32>
    %51 = tpu.matmul %50, %48, %cst_40 {dimension_numbers = #tpu.dot_dimension_numbers<[1], [0], [0], [1], [0, 0, 1, 1], [], []>} : vector<4x128xbf16>, vector<128x128xbf16>, vector<4x128xf32> -> vector<4x128xf32>
    %52 = vector.broadcast %49 : vector<1x128xf32> to vector<4x128xf32>
    %53 = arith.addf %51, %52 : vector<4x128xf32>
    %cst_41 = arith.constant 0.000000e+00 : f32
    %54 = vector.broadcast %cst_41 : f32 to vector<4x128xf32>
    %55 = arith.maximumf %53, %54 : vector<4x128xf32>
    %c0_42 = arith.constant 0 : index
    %c0_43 = arith.constant 0 : index
    %56 = vector.load %arg16[%c0_42, %c0_43] : memref<128x128xbf16, #tpu.memory_space<vmem>>, vector<128x128xbf16>
    %c0_44 = arith.constant 0 : index
    %c0_45 = arith.constant 0 : index
    %57 = vector.load %arg17[%c0_44, %c0_45] : memref<1x128xf32, #tpu.memory_space<vmem>>, vector<1x128xf32>
    %58 = arith.truncf %55 : vector<4x128xf32> to vector<4x128xbf16>
    %cst_46 = arith.constant dense<0.000000e+00> : vector<4x128xf32>
    %59 = tpu.matmul %58, %56, %cst_46 {dimension_numbers = #tpu.dot_dimension_numbers<[1], [0], [0], [1], [0, 0, 1, 1], [], []>} : vector<4x128xbf16>, vector<128x128xbf16>, vector<4x128xf32> -> vector<4x128xf32>
    %60 = vector.broadcast %57 : vector<1x128xf32> to vector<4x128xf32>
    %61 = arith.addf %59, %60 : vector<4x128xf32>
    %cst_47 = arith.constant 0.000000e+00 : f32
    %62 = vector.broadcast %cst_47 : f32 to vector<4x128xf32>
    %63 = arith.maximumf %61, %62 : vector<4x128xf32>
    %c0_48 = arith.constant 0 : index
    %c0_49 = arith.constant 0 : index
    %64 = vector.load %arg18[%c0_48, %c0_49] : memref<128x512xbf16, #tpu.memory_space<vmem>>, vector<128x512xbf16>
    %c0_50 = arith.constant 0 : index
    %c0_51 = arith.constant 0 : index
    %65 = vector.load %arg19[%c0_50, %c0_51] : memref<1x512xf32, #tpu.memory_space<vmem>>, vector<1x512xf32>
    %66 = arith.truncf %63 : vector<4x128xf32> to vector<4x128xbf16>
    %cst_52 = arith.constant dense<0.000000e+00> : vector<4x512xf32>
    %67 = tpu.matmul %66, %64, %cst_52 {dimension_numbers = #tpu.dot_dimension_numbers<[1], [0], [0], [1], [0, 0, 1, 1], [], []>} : vector<4x128xbf16>, vector<128x512xbf16>, vector<4x512xf32> -> vector<4x512xf32>
    %68 = vector.broadcast %65 : vector<1x512xf32> to vector<4x512xf32>
    %69 = arith.addf %67, %68 : vector<4x512xf32>
    %c0_53 = arith.constant 0 : index
    %c0_54 = arith.constant 0 : index
    %70 = vector.load %arg20[%c0_53, %c0_54] : memref<4x512xf32, #tpu.memory_space<vmem>>, vector<4x512xf32>
    tpu.vector_store %arg20[%c0_53, %c0_54], %69 {strides = array<i32>} : memref<4x512xf32, #tpu.memory_space<vmem>>, vector<4x512xf32>,
    return
  }
  func.func @transform_0(%arg0: i32) -> (i32, i32) {
    %c0_i32 = arith.constant 0 : i32
    %c0_i32_0 = arith.constant 0 : i32
    return %arg0, %c0_i32 : i32, i32
  }
  func.func @transform_1(%arg0: i32) -> (i32, i32) {
    %c0_i32 = arith.constant 0 : i32
    %c0_i32_0 = arith.constant 0 : i32
    %c0_i32_1 = arith.constant 0 : i32
    return %c0_i32, %c0_i32_0 : i32, i32
  }
  func.func @transform_2(%arg0: i32) -> (i32, i32) {
    %c0_i32 = arith.constant 0 : i32
    %c0_i32_0 = arith.constant 0 : i32
    %c0_i32_1 = arith.constant 0 : i32
    return %c0_i32, %c0_i32_0 : i32, i32
  }
  func.func @transform_3(%arg0: i32) -> (i32, i32) {
    %c0_i32 = arith.constant 0 : i32
    %c0_i32_0 = arith.constant 0 : i32
    %c0_i32_1 = arith.constant 0 : i32
    return %c0_i32, %c0_i32_0 : i32, i32
  }
  func.func @transform_4(%arg0: i32) -> (i32, i32) {
    %c0_i32 = arith.constant 0 : i32
    %c0_i32_0 = arith.constant 0 : i32
    %c0_i32_1 = arith.constant 0 : i32
    return %c0_i32, %c0_i32_0 : i32, i32
  }
  func.func @transform_5(%arg0: i32) -> (i32, i32) {
    %c0_i32 = arith.constant 0 : i32
    %c0_i32_0 = arith.constant 0 : i32
    %c0_i32_1 = arith.constant 0 : i32
    return %c0_i32, %c0_i32_0 : i32, i32
  }
  func.func @transform_6(%arg0: i32) -> (i32, i32) {
    %c0_i32 = arith.constant 0 : i32
    %c0_i32_0 = arith.constant 0 : i32
    %c0_i32_1 = arith.constant 0 : i32
    return %c0_i32, %c0_i32_0 : i32, i32
  }
  func.func @transform_7(%arg0: i32) -> (i32, i32) {
    %c0_i32 = arith.constant 0 : i32
    %c0_i32_0 = arith.constant 0 : i32
    %c0_i32_1 = arith.constant 0 : i32
    return %c0_i32, %c0_i32_0 : i32, i32
  }
  func.func @transform_8(%arg0: i32) -> (i32, i32) {
    %c0_i32 = arith.constant 0 : i32
    %c0_i32_0 = arith.constant 0 : i32
    %c0_i32_1 = arith.constant 0 : i32
    return %c0_i32, %c0_i32_0 : i32, i32
  }
  func.func @transform_9(%arg0: i32) -> (i32, i32) {
    %c0_i32 = arith.constant 0 : i32
    %c0_i32_0 = arith.constant 0 : i32
    %c0_i32_1 = arith.constant 0 : i32
    return %c0_i32, %c0_i32_0 : i32, i32
  }
  func.func @transform_10(%arg0: i32) -> (i32, i32) {
    %c0_i32 = arith.constant 0 : i32
    %c0_i32_0 = arith.constant 0 : i32
    %c0_i32_1 = arith.constant 0 : i32
    return %c0_i32, %c0_i32_0 : i32, i32
  }
  func.func @transform_11(%arg0: i32) -> (i32, i32) {
    %c0_i32 = arith.constant 0 : i32
    %c0_i32_0 = arith.constant 0 : i32
    %c0_i32_1 = arith.constant 0 : i32
    return %c0_i32, %c0_i32_0 : i32, i32
  }
  func.func @transform_12(%arg0: i32) -> (i32, i32) {
    %c0_i32 = arith.constant 0 : i32
    %c0_i32_0 = arith.constant 0 : i32
    %c0_i32_1 = arith.constant 0 : i32
    return %c0_i32, %c0_i32_0 : i32, i32
  }
  func.func @transform_13(%arg0: i32) -> (i32, i32) {
    %c0_i32 = arith.constant 0 : i32
    %c0_i32_0 = arith.constant 0 : i32
    %c0_i32_1 = arith.constant 0 : i32
    return %c0_i32, %c0_i32_0 : i32, i32
  }
  func.func @transform_14(%arg0: i32) -> (i32, i32) {
    %c0_i32 = arith.constant 0 : i32
    %c0_i32_0 = arith.constant 0 : i32
    %c0_i32_1 = arith.constant 0 : i32
    return %c0_i32, %c0_i32_0 : i32, i32
  }
  func.func @transform_15(%arg0: i32) -> (i32, i32) {
    %c0_i32 = arith.constant 0 : i32
    %c0_i32_0 = arith.constant 0 : i32
    %c0_i32_1 = arith.constant 0 : i32
    return %c0_i32, %c0_i32_0 : i32, i32
  }
  func.func @transform_16(%arg0: i32) -> (i32, i32) {
    %c0_i32 = arith.constant 0 : i32
    %c0_i32_0 = arith.constant 0 : i32
    %c0_i32_1 = arith.constant 0 : i32
    return %c0_i32, %c0_i32_0 : i32, i32
  }
  func.func @transform_17(%arg0: i32) -> (i32, i32) {
    %c0_i32 = arith.constant 0 : i32
    %c0_i32_0 = arith.constant 0 : i32
    %c0_i32_1 = arith.constant 0 : i32
    return %c0_i32, %c0_i32_0 : i32, i32
  }
  func.func @transform_18(%arg0: i32) -> (i32, i32) {
    %c0_i32 = arith.constant 0 : i32
    %c0_i32_0 = arith.constant 0 : i32
    %c0_i32_1 = arith.constant 0 : i32
    return %c0_i32, %c0_i32_0 : i32, i32
  }
  func.func @transform_19(%arg0: i32) -> (i32, i32) {
    %c0_i32 = arith.constant 0 : i32
    %c0_i32_0 = arith.constant 0 : i32
    return %arg0, %c0_i32 : i32, i32
  }
}

</mosaic_0001>

<bundles_post_ra>
// kernel: npi_forward.1
= control target key start
LH: loop header
LB: loop body
LE: loop exit
PB: predicated region body
PF: predicated region fallthrough
CT: control target
= control target key end

     0   :  { %s2834_s0 = inlined_call_operand.vmem [shape: bf16[4,512], index: 0, kind: input, shape index: {}]   ;;  %s2835_s1 = inlined_call_operand.vmem [shape: bf16[512,128], index: 1, kind: input, shape index: {}]   ;;  %s2836_s2 = inlined_call_operand.vmem [shape: f32[1,128], index: 2, kind: input, shape index: {}]   ;;  %s2837_s3 = inlined_call_operand.hbm [shape: bf16[128,128], index: 3, kind: input, shape index: {}]   ;;  %s2838_s4 = inlined_call_operand.vmem [shape: f32[1,128], index: 4, kind: input, shape index: {}]   ;;  %s2839_s5 = inlined_call_operand.vmem [shape: bf16[128,128], index: 5, kind: input, shape index: {}]   ;;  %s2840_s6 = inlined_call_operand.vmem [shape: f32[1,128], index: 6, kind: input, shape index: {}]   ;;  %s2841_s7 = inlined_call_operand.hbm [shape: bf16[128,128], index: 7, kind: input, shape index: {}]   ;;  %s2842_s8 = inlined_call_operand.vmem [shape: f32[1,128], index: 8, kind: input, shape index: {}]   ;;  %s2843_s9 = inlined_call_operand.hbm [shape: bf16[128,128], index: 9, kind: input, shape index: {}]   ;;  %s2844_s10 = inlined_call_operand.vmem [shape: f32[1,128], index: 10, kind: input, shape index: {}]   ;;  %s2845_s11 = inlined_call_operand.hbm [shape: bf16[128,128], index: 11, kind: input, shape index: {}]   ;;  %s2846_s12 = inlined_call_operand.vmem [shape: f32[1,128], index: 12, kind: input, shape index: {}]   ;;  %s2847_s13 = inlined_call_operand.hbm [shape: bf16[128,128], index: 13, kind: input, shape index: {}]   ;;  %s2848_s14 = inlined_call_operand.vmem [shape: f32[1,128], index: 14, kind: input, shape index: {}]   ;;  %s2849_s15 = inlined_call_operand.hbm [shape: bf16[128,128], index: 15, kind: input, shape index: {}]   ;;  %s2850_s16 = inlined_call_operand.vmem [shape: f32[1,128], index: 16, kind: input, shape index: {}]   ;;  %s2851_s17 = inlined_call_operand.vmem [shape: bf16[128,512], index: 17, kind: input, shape index: {}]   ;;  %s2852_s18 = inlined_call_operand.vmem [shape: f32[1,512], index: 18, kind: input, shape index: {}]   ;;  %s2853_s19 = inlined_call_operand.vmem [shape: f32[4,512], index: 19, kind: output, shape index: {}]  }
   0x1   :  { %2857 = sst [smem:[#allocation16_spill]] %s2834_s0 }
   0x2   :  { %2858 = sst [smem:[#allocation17_spill]] %s2835_s1 }
   0x3   :  { %2859 = sst [smem:[#allocation18_spill]] %s2836_s2 }
   0x4   :  { %2860 = sst [smem:[#allocation19_spill]] %s2837_s3 }
   0x5   :  { %2861 = sst [smem:[#allocation20_spill]] %s2853_s19 }
   0x6   :  { %24 = vsyncpa [#allocation3], 0 }
   0x7   :  { %25 = vsyncpa [#allocation5], 0 }
   0x8   :  { %26 = vsyncpa [#allocation8], 0 }
   0x9   :  { %27 = vsyncpa [#allocation11], 0  ;;  %s2282_s0 = smov [#allocation4]   ;;  %s2283_s20 = smov [#allocation7]  }
   0xa   :  { %s57_s30 = sshll.u32 %s2282_s0, 4  ;;  %s85_s21 = sshll.u32 %s2283_s20, 4  ;;  %s58_s30 = int_to_ptr.vmem [resolvable:$true] %s57_s30  ;;  %s2394_s21 = int_to_ptr.vmem [resolvable:$true] %s85_s21 }
   0xb   :  { %s2142_s2 = scalar_lea.hbm %s2841_s7, 1024 }
   0xc   :  { %p2143_p0 = scmp.ne.s32.totalorder %s2841_s7, %s2142_s2  ;;  %p2146_p1 = scmp.lt.u32.totalorder %s2142_s2, %s2841_s7 }
   0xe   :  { %p2148_p2 = pnand %p2146_p1, %p2143_p0 }
  0x10   :  { %2151 = shalt.err (!%p2148_p2)
}
  0x11   :  { %s2152_s26 = scalar_lea.vmem %s58_s30, 1024  ;;  %p2157_p4 = scmp.lt.s32.totalorder %s58_s30, %s58_s30 }
  0x12   :  { %p2153_p3 = scmp.ne.s32.totalorder %s58_s30, %s2152_s26  ;;  %p2158_p5 = scmp.lt.s32.totalorder %s2152_s26, %s2152_s26 }
  0x14   :  { %p2159_p6 = por %p2158_p5, %p2157_p4 }
  0x16   :  { %p2160_p7 = pnand %p2159_p6, %p2153_p3 }
  0x18   :  { %2163 = shalt.err (!%p2160_p7)
}
  0x19   :  { %s2284_s27 = smov 64   ;;  %s2285_s28 = smov 4  }
  0x1a   :  { %63 = dma.hbm_to_vmem [thread:$0]  %s2841_s7, 1024, %s58_s30, [#allocation5], %s2284_s27, %s2284_s27, %s2285_s28  }
  0x1b   :  { %s2164_s22 = scalar_lea.hbm %s2845_s11, 1024 }
  0x1c   :  { %p2165_p8 = scmp.ne.s32.totalorder %s2845_s11, %s2164_s22  ;;  %p2168_p9 = scmp.lt.u32.totalorder %s2164_s22, %s2845_s11 }
  0x1e   :  { %p2170_p10 = pnand %p2168_p9, %p2165_p8 }
  0x20   :  { %2173 = shalt.err (!%p2170_p10)
}
  0x21   :  { %s2174_s3 = scalar_lea.vmem %s2394_s21, 1024  ;;  %p2179_p12 = scmp.lt.s32.totalorder %s2394_s21, %s2394_s21 }
  0x22   :  { %p2175_p11 = scmp.ne.s32.totalorder %s2394_s21, %s2174_s3  ;;  %p2180_p13 = scmp.lt.s32.totalorder %s2174_s3, %s2174_s3 }
  0x24   :  { %p2181_p0 = por %p2180_p13, %p2179_p12 }
  0x26   :  { %p2182_p1 = pnand %p2181_p0, %p2175_p11 }
  0x28   :  { %2185 = shalt.err (!%p2182_p1)
}
  0x29   :  { %91 = dma.hbm_to_vmem [thread:$0]  %s2845_s11, 1024, %s2394_s21, [#allocation8], %s2284_s27, %s2284_s27, %s2285_s28  }
  0x2a   :  { %s2286_s26 = smov [#allocation2]   ;;  %s2287_s0 = smov [#allocation6]  }
  0x2b   :  { %s39_s29 = sshll.u32 %s2286_s26, 4  ;;  %s71_s20 = sshll.u32 %s2287_s0, 4  ;;  %s40_s29 = int_to_ptr.vmem [resolvable:$true] %s39_s29  ;;  %s2431_s20 = int_to_ptr.vmem [resolvable:$true] %s71_s20 }
  0x2c   :  { %s2862_s2 = sld [smem:[#allocation19_spill]] }
  0x32   :  { %s2186_s23 = scalar_lea.hbm %s2862_s2, 1024 }
  0x33   :  { %p2187_p2 = scmp.ne.s32.totalorder %s2862_s2, %s2186_s23  ;;  %p2190_p3 = scmp.lt.u32.totalorder %s2186_s23, %s2862_s2 }
  0x35   :  { %p2192_p4 = pnand %p2190_p3, %p2187_p2 }
  0x37   :  { %2195 = shalt.err (!%p2192_p4)
}
  0x38   :  { %s2196_s11 = scalar_lea.vmem %s40_s29, 1024  ;;  %p2201_p6 = scmp.lt.s32.totalorder %s40_s29, %s40_s29 }
  0x39   :  { %p2197_p5 = scmp.ne.s32.totalorder %s40_s29, %s2196_s11  ;;  %p2202_p7 = scmp.lt.s32.totalorder %s2196_s11, %s2196_s11 }
  0x3b   :  { %p2203_p8 = por %p2202_p7, %p2201_p6 }
  0x3d   :  { %p2204_p9 = pnand %p2203_p8, %p2197_p5 }
  0x3f   :  { %2207 = shalt.err (!%p2204_p9)
}
  0x40   :  { %45 = dma.hbm_to_vmem [thread:$0]  %s2862_s2, 1024, %s40_s29, [#allocation3], %s2284_s27, %s2284_s27, %s2285_s28  }
  0x41   :  { %s2208_s19 = scalar_lea.hbm %s2843_s9, 1024 }
  0x42   :  { %p2209_p10 = scmp.ne.s32.totalorder %s2843_s9, %s2208_s19  ;;  %p2212_p11 = scmp.lt.u32.totalorder %s2208_s19, %s2843_s9 }
  0x44   :  { %p2214_p12 = pnand %p2212_p11, %p2209_p10 }
  0x46   :  { %2217 = shalt.err (!%p2214_p12)
}
  0x47   :  { %s2218_s24 = scalar_lea.vmem %s2431_s20, 1024  ;;  %p2223_p0 = scmp.lt.s32.totalorder %s2431_s20, %s2431_s20 }
  0x48   :  { %p2219_p13 = scmp.ne.s32.totalorder %s2431_s20, %s2218_s24  ;;  %p2224_p1 = scmp.lt.s32.totalorder %s2218_s24, %s2218_s24 }
  0x4a   :  { %p2225_p2 = por %p2224_p1, %p2223_p0 }
  0x4c   :  { %p2226_p3 = pnand %p2225_p2, %p2219_p13 }
  0x4e   :  { %2229 = shalt.err (!%p2226_p3)
}
  0x4f   :  { %77 = dma.hbm_to_vmem [thread:$0]  %s2843_s9, 1024, %s2431_s20, [#allocation5], %s2284_s27, %s2284_s27, %s2285_s28  }
  0x50   :  { %s2288_s25 = smov [#allocation9]   ;;  %s2289_s11 = smov [#allocation10]  }
  0x51   :  { %s99_s3 = sshll.u32 %s2288_s25, 4  ;;  %s113_s21 = sshll.u32 %s2289_s11, 4  ;;  %s100_s3 = int_to_ptr.vmem [resolvable:$true] %s99_s3  ;;  %s2468_s21 = int_to_ptr.vmem [resolvable:$true] %s113_s21 }
  0x52   :  { %s2230_s26 = scalar_lea.hbm %s2847_s13, 1024 }
  0x53   :  { %p2231_p4 = scmp.ne.s32.totalorder %s2847_s13, %s2230_s26  ;;  %p2234_p5 = scmp.lt.u32.totalorder %s2230_s26, %s2847_s13 }
  0x55   :  { %p2236_p6 = pnand %p2234_p5, %p2231_p4 }
  0x57   :  { %2239 = shalt.err (!%p2236_p6)
}
  0x58   :  { %s2240_s9 = scalar_lea.vmem %s100_s3, 1024  ;;  %p2245_p8 = scmp.lt.s32.totalorder %s100_s3, %s100_s3 }
  0x59   :  { %p2241_p7 = scmp.ne.s32.totalorder %s100_s3, %s2240_s9  ;;  %p2246_p9 = scmp.lt.s32.totalorder %s2240_s9, %s2240_s9 }
  0x5b   :  { %p2247_p10 = por %p2246_p9, %p2245_p8 }
  0x5d   :  { %p2248_p11 = pnand %p2247_p10, %p2241_p7 }
  0x5f   :  { %2251 = shalt.err (!%p2248_p11)
}
  0x60   :  { %105 = dma.hbm_to_vmem [thread:$0]  %s2847_s13, 1024, %s100_s3, [#allocation8], %s2284_s27, %s2284_s27, %s2285_s28  }
  0x61   :  { %s2252_s2 = scalar_lea.hbm %s2849_s15, 1024 }
  0x62   :  { %p2253_p12 = scmp.ne.s32.totalorder %s2849_s15, %s2252_s2  ;;  %p2256_p13 = scmp.lt.u32.totalorder %s2252_s2, %s2849_s15 }
  0x64   :  { %p2258_p0 = pnand %p2256_p13, %p2253_p12 }
  0x66   :  { %2261 = shalt.err (!%p2258_p0)
}
  0x67   :  { %s2262_s26 = scalar_lea.vmem %s2468_s21, 1024  ;;  %p2267_p2 = scmp.lt.s32.totalorder %s2468_s21, %s2468_s21 }
  0x68   :  { %p2263_p1 = scmp.ne.s32.totalorder %s2468_s21, %s2262_s26  ;;  %p2268_p3 = scmp.lt.s32.totalorder %s2262_s26, %s2262_s26 }
  0x6a   :  { %p2269_p4 = por %p2268_p3, %p2267_p2 }
  0x6c   :  { %p2270_p5 = pnand %p2269_p4, %p2263_p1 }
  0x6e   :  { %2273 = shalt.err (!%p2270_p5)
}
  0x6f   :  { %119 = dma.hbm_to_vmem [thread:$0]  %s2849_s15, 1024, %s2468_s21, [#allocation11], %s2284_s27, %s2284_s27, %s2285_s28  }
  0x70   :  { %2274 = dma.done.wait [#allocation3], 1024  }
  0x71   :  { %2275 = vsyncadd [#allocation3], 4294966272 }
  0x72   :  { %2276 = dma.done.wait [#allocation5], 2048  }
  0x73   :  { %2277 = vsyncadd [#allocation5], 4294965248 }
  0x74   :  { %2278 = dma.done.wait [#allocation8], 2048  }
  0x75   :  { %2279 = vsyncadd [#allocation8], 4294965248 }
  0x76   :  { %2280 = dma.done.wait [#allocation11], 1024  }
  0x77   :  { %2281 = vsyncadd [#allocation11], 4294966272  ;;  %s2863_s1 = sld [smem:[#allocation17_spill]]  ;;  %v2290_v22 = vmov 1983009808   ;;  %v222_v24 = vlaneseq  ;;  %s2864_s15 = sld [smem:[#allocation16_spill]] }
  0x78   :  { %v220_v23 = vunpack.c.l.s4 %v2290_v22  ;;  %v2291_v41 = vmov 0.0   ;;  %v2038_v44 = vld [vmem:[#allocation2] sm:$0xff]   ;;  %v2039_v46 = vld [vmem:[#allocation2 + $0x8] sm:$0xff]   ;;  %v2040_v47 = vld [vmem:[#allocation2 + $0x10] sm:$0xff]   ;;  %vm2292_vm0 = vmmov 0   ;;  %s2865_s19 = sld [smem:[#allocation18_spill]] }
  0x79   :  { %v2583_v30 = vshrl.u32 %v222_v24, 7  ;;  %v2041_v48 = vld [vmem:[#allocation2 + $0x18] sm:$0xff]   ;;  %v2042_v49 = vld [vmem:[#allocation2 + $0x20] sm:$0xff]   ;;  %v2043_v50 = vld [vmem:[#allocation2 + $0x28] sm:$0xff]   ;;  %s2866_s0 = sld [smem:[#allocation20_spill]] }
  0x7a   :  { %v221_v29 = vunpack.c.0.s8 %v220_v23  ;;  %v2044_v51 = vld [vmem:[#allocation2 + $0x30] sm:$0xff]   ;;  %v2045_v52 = vld [vmem:[#allocation2 + $0x38] sm:$0xff]   ;;  %v2046_v53 = vld [vmem:[%s2839_s5] sm:$0xff]  }
  0x7b   :  { %v2047_v54 = vld [vmem:[%s2839_s5 + $0x8] sm:$0xff]   ;;  %v2048_v55 = vld [vmem:[%s2839_s5 + $0x10] sm:$0xff]   ;;  %v2049_v56 = vld [vmem:[%s2839_s5 + $0x18] sm:$0xff]  }
  0x7c   :  { %v224_v35 = vsub.s32 %v221_v29, %v2583_v30  ;;  %v2050_v57 = vld [vmem:[%s2839_s5 + $0x20] sm:$0xff]   ;;  %v2051_v58 = vld [vmem:[%s2839_s5 + $0x28] sm:$0xff]  }
  0x7d   :  { %v2005_v0 = vld [vmem:[%s2863_s1 + $0x40] sm:$0xff]   ;;  %v2009_v4 = vld [vmem:[%s2863_s1 + $0x48] sm:$0xff]   ;;  %v2013_v8 = vld [vmem:[%s2863_s1 + $0x50] sm:$0xff]  }
  0x7e   :  { %v2006_v1 = vld [vmem:[%s2863_s1 + $0xc0] sm:$0xff]   ;;  %1746 = vmatprep.subr.bf16.mxu0 %v2005_v0  ;;  %v2010_v5 = vld [vmem:[%s2863_s1 + $0xc8] sm:$0xff]   ;;  %v2014_v9 = vld [vmem:[%s2863_s1 + $0xd0] sm:$0xff]  }
  0x7f   :  { %v2007_v2 = vld [vmem:[%s2863_s1] sm:$0xff]   ;;  %1768 = vmatprep.subr.bf16.mxu1 %v2006_v1  ;;  %v2011_v6 = vld [vmem:[%s2863_s1 + $0x8] sm:$0xff]   ;;  %v2015_v10 = vld [vmem:[%s2863_s1 + $0x10] sm:$0xff]  }
  0x80   :  { %v2008_v3 = vld [vmem:[%s2863_s1 + $0x80] sm:$0xff]   ;;  %1747 = vmatpush3.bf16.msra.mxu0 %v2007_v2  ;;  %v2012_v7 = vld [vmem:[%s2863_s1 + $0x88] sm:$0xff]   ;;  %v2016_v11 = vld [vmem:[%s2863_s1 + $0x90] sm:$0xff]  }
  0x81   :  { %1769 = vmatpush3.bf16.msra.mxu1 %v2008_v3  ;;  %1748 = vmatprep.subr.bf16.mxu0 %v2009_v4  ;;  %v2017_v12 = vld [vmem:[%s2863_s1 + $0x58] sm:$0xff]   ;;  %v2021_v16 = vld [vmem:[%s2863_s1 + $0x60] sm:$0xff]   ;;  %v2025_v20 = vld [vmem:[%s2863_s1 + $0x68] sm:$0xff]  }
  0x82   :  { %1770 = vmatprep.subr.bf16.mxu1 %v2010_v5  ;;  %v2018_v13 = vld [vmem:[%s2863_s1 + $0xd8] sm:$0xff]   ;;  %v2022_v17 = vld [vmem:[%s2863_s1 + $0xe0] sm:$0xff]   ;;  %v2026_v21 = vld [vmem:[%s2863_s1 + $0xe8] sm:$0xff]  }
  0x83   :  { %v2019_v14 = vld [vmem:[%s2863_s1 + $0x18] sm:$0xff]   ;;  %v2023_v18 = vld [vmem:[%s2863_s1 + $0x20] sm:$0xff]   ;;  %v2027_v25 = vld [vmem:[%s2863_s1 + $0x28] sm:$0xff]  }
  0x84   :  { %1749 = vmatpush3.bf16.msra.mxu0 %v2011_v6  ;;  %v2020_v15 = vld [vmem:[%s2863_s1 + $0x98] sm:$0xff]   ;;  %v2024_v19 = vld [vmem:[%s2863_s1 + $0xa0] sm:$0xff]   ;;  %v2028_v26 = vld [vmem:[%s2863_s1 + $0xa8] sm:$0xff]  }
  0x85   :  { %1771 = vmatpush3.bf16.msra.mxu1 %v2012_v7  ;;  %1750 = vmatprep.subr.bf16.mxu0 %v2013_v8  ;;  %v2029_v27 = vld [vmem:[%s2863_s1 + $0x70] sm:$0xff]   ;;  %v2033_v33 = vld [vmem:[%s2863_s1 + $0x78] sm:$0xff]   ;;  %v145_v38 = vld [vmem:[%s2864_s15] sm:$0xff] }
  0x86   :  { %1772 = vmatprep.subr.bf16.mxu1 %v2014_v9  ;;  %v2030_v28 = vld [vmem:[%s2863_s1 + $0xf0] sm:$0xff]   ;;  %v2034_v34 = vld [vmem:[%s2863_s1 + $0xf8] sm:$0xff]   ;;  %v225_v39 = vrot.slane %v145_v38, %v224_v35  ;;  %v218_v40 = vcombine.high %v145_v38, %v145_v38  ;;  %v1618_v60 = vld [vmem:[%s2865_s19] ss:$0 sm:$0xff] }
  0x87   :  { %v2031_v31 = vld [vmem:[%s2863_s1 + $0x30] sm:$0xff]   ;;  %v2035_v36 = vld [vmem:[%s2863_s1 + $0x38] sm:$0xff]   ;;  %v2063_v29 = vld [vmem:[#allocation6 + $0x8] sm:$0xff]  }
  0x88   :  { %1751 = vmatpush3.bf16.msra.mxu0 %v2015_v10  ;;  %v2032_v32 = vld [vmem:[%s2863_s1 + $0xb0] sm:$0xff]   ;;  %v2036_v37 = vld [vmem:[%s2863_s1 + $0xb8] sm:$0xff]   ;;  %v233_v42 = vcombine.high %v225_v39, %v225_v39  ;;  %v232_v43 = vrot.slane %v218_v40, %v224_v35  ;;  %v1660_v35 = vld [vmem:[%s2840_s6] ss:$0 sm:$0xff] }
  0x89   :  { %1773 = vmatpush3.bf16.msra.mxu1 %v2016_v11  ;;  %1752 = vmatprep.subr.bf16.mxu0 %v2017_v12  ;;  %v2052_v10 = vld [vmem:[%s2839_s5 + $0x30] sm:$0xff]   ;;  %v2053_v11 = vld [vmem:[%s2839_s5 + $0x38] sm:$0xff]   ;;  %v2054_v12 = vld [vmem:[#allocation4] sm:$0xff]  }
  0x8a   :  { %1774 = vmatprep.subr.bf16.mxu1 %v2018_v13  ;;  %463 = vmatprep.mubr.bf16.mxu0 %v233_v42  ;;  %v234_v45 = vcombine.high %v232_v43, %v232_v43  ;;  %v2055_v13 = vld [vmem:[#allocation4 + $0x8] sm:$0xff]  }
  0x8c   :  { %1753 = vmatpush3.bf16.msra.mxu0 %v2019_v14  ;;  %503 = vmatprep.mubr.bf16.mxu1 %v234_v45  ;;  %v2056_v14 = vld [vmem:[#allocation4 + $0x10] sm:$0xff]   ;;  %v2069_v45 = vld [vmem:[#allocation6 + $0x38] sm:$0xff]  }
  0x8d   :  { %1775 = vmatpush3.bf16.msra.mxu1 %v2020_v15  ;;  %1754 = vmatprep.subr.bf16.mxu0 %v2021_v16  ;;  %v2057_v15 = vld [vmem:[#allocation4 + $0x18] sm:$0xff]   ;;  %v2058_v16 = vld [vmem:[#allocation4 + $0x20] sm:$0xff]  }
  0x8e   :  { %1776 = vmatprep.subr.bf16.mxu1 %v2022_v17  ;;  %v2059_v17 = vld [vmem:[#allocation4 + $0x28] sm:$0xff]  }
  0x90   :  { %1755 = vmatpush3.bf16.msra.mxu0 %v2023_v18  ;;  %v1651_v18 = vld [vmem:[%s2838_s4] ss:$0 sm:$0xff] }
  0x91   :  { %1777 = vmatpush3.bf16.msra.mxu1 %v2024_v19  ;;  %1756 = vmatprep.subr.bf16.mxu0 %v2025_v20 }
  0x92   :  { %1778 = vmatprep.subr.bf16.mxu1 %v2026_v21 }
  0x94   :  { %1757 = vmatpush3.bf16.msra.mxu0 %v2027_v25 }
  0x95   :  { %1779 = vmatpush3.bf16.msra.mxu1 %v2028_v26  ;;  %1758 = vmatprep.subr.bf16.mxu0 %v2029_v27  ;;  %v2060_v26 = vld [vmem:[#allocation4 + $0x30] sm:$0xff]   ;;  %v2061_v27 = vld [vmem:[#allocation4 + $0x38] sm:$0xff]  }
  0x96   :  { %1780 = vmatprep.subr.bf16.mxu1 %v2030_v28  ;;  %v2062_v28 = vld [vmem:[#allocation6] sm:$0xff]  }
  0x98   :  { %1759 = vmatpush3.bf16.msra.mxu0 %v2031_v31  ;;  %v2064_v31 = vld [vmem:[#allocation6 + $0x10] sm:$0xff]  }
  0x99   :  { %1781 = vmatpush3.bf16.msra.mxu1 %v2032_v32  ;;  %1760 = vmatprep.subr.bf16.mxu0 %v2033_v33  ;;  %v2065_v32 = vld [vmem:[#allocation6 + $0x18] sm:$0xff]   ;;  %v2066_v33 = vld [vmem:[#allocation6 + $0x20] sm:$0xff]  }
  0x9a   :  { %1782 = vmatprep.subr.bf16.mxu1 %v2034_v34  ;;  %v2067_v34 = vld [vmem:[#allocation6 + $0x28] sm:$0xff]  }
  0x9c   :  { %1761 = vmatpush3.bf16.msra.mxu0 %v2035_v36 }
  0x9d   :  { %1783 = vmatpush3.bf16.msra.mxu1 %v2036_v37  ;;  %1853 = vmatprep.subr.bf16.mxu0 %v2291_v41 }
  0x9e   :  { %1873 = vmatprep.subr.bf16.mxu1 %v2291_v41 }
  0x9f   :  { %464 = vmatmul.mubr.bf16.vlgmr.msra.gmra.mrb[0].mxu0 %v225_v39 }
  0xa0   :  { %1854 = vmatpush3.bf16.msra.mxu0 %v2038_v44  ;;  %504 = vmatmul.mubr.bf16.vlgmr.msra.gmra.mrb[0].mxu1 %v232_v43  ;;  %v2068_v44 = vld [vmem:[#allocation6 + $0x30] sm:$0xff]  }
  0xa1   :  { %1855 = vmatprep.subr.bf16.mxu0 %v2291_v41  ;;  %1869 = vmatprep.mubr.msk.bf16.mxu0 %vm2292_vm0, %v2291_v41 }
  0xa2   :  { %1889 = vmatprep.mubr.msk.bf16.mxu1 %vm2292_vm0, %v2291_v41  ;;  %1874 = vmatpush3.bf16.msra.mxu1 %v2046_v53 }
  0xa3   :  { %1875 = vmatprep.subr.bf16.mxu1 %v2291_v41 }
  0xa4   :  { %1856 = vmatpush3.bf16.msra.mxu0 %v2039_v46  ;;  %v2070_v46 = vld [vmem:[#allocation7] sm:$0xff]  }
  0xa5   :  { %1857 = vmatprep.subr.bf16.mxu0 %v2291_v41 }
  0xa6   :  { %1876 = vmatpush3.bf16.msra.mxu1 %v2047_v54 }
  0xa7   :  { %1877 = vmatprep.subr.bf16.mxu1 %v2291_v41 }
  0xa8   :  { %1858 = vmatpush3.bf16.msra.mxu0 %v2040_v47  ;;  %v2071_v47 = vld [vmem:[#allocation7 + $0x8] sm:$0xff]  }
  0xa9   :  { %1859 = vmatprep.subr.bf16.mxu0 %v2291_v41 }
  0xaa   :  { %1878 = vmatpush3.bf16.msra.mxu1 %v2048_v55 }
  0xab   :  { %1879 = vmatprep.subr.bf16.mxu1 %v2291_v41 }
  0xac   :  { %1860 = vmatpush3.bf16.msra.mxu0 %v2041_v48  ;;  %v2072_v48 = vld [vmem:[#allocation7 + $0x10] sm:$0xff]  }
  0xad   :  { %1861 = vmatprep.subr.bf16.mxu0 %v2291_v41 }
  0xae   :  { %1880 = vmatpush3.bf16.msra.mxu1 %v2049_v56 }
  0xaf   :  { %1881 = vmatprep.subr.bf16.mxu1 %v2291_v41 }
  0xb0   :  { %1862 = vmatpush3.bf16.msra.mxu0 %v2042_v49  ;;  %v2073_v49 = vld [vmem:[#allocation7 + $0x18] sm:$0xff]  }
  0xb1   :  { %1863 = vmatprep.subr.bf16.mxu0 %v2291_v41 }
  0xb2   :  { %1882 = vmatpush3.bf16.msra.mxu1 %v2050_v57 }
  0xb3   :  { %1883 = vmatprep.subr.bf16.mxu1 %v2291_v41 }
  0xb4   :  { %1864 = vmatpush3.bf16.msra.mxu0 %v2043_v50  ;;  %v2074_v50 = vld [vmem:[#allocation7 + $0x20] sm:$0xff]  }
  0xb5   :  { %1865 = vmatprep.subr.bf16.mxu0 %v2291_v41 }
  0xb6   :  { %1884 = vmatpush3.bf16.msra.mxu1 %v2051_v58 }
  0xb7   :  { %1885 = vmatprep.subr.bf16.mxu1 %v2291_v41 }
  0xb8   :  { %1866 = vmatpush3.bf16.msra.mxu0 %v2044_v51  ;;  %v2075_v51 = vld [vmem:[#allocation7 + $0x28] sm:$0xff]  }
  0xb9   :  { %1867 = vmatprep.subr.bf16.mxu0 %v2291_v41 }
  0xba   :  { %1886 = vmatpush3.bf16.msra.mxu1 %v2052_v10 }
  0xbb   :  { %1887 = vmatprep.subr.bf16.mxu1 %v2291_v41 }
  0xbc   :  { %1868 = vmatpush3.bf16.msra.mxu0 %v2045_v52  ;;  %v1669_v52 = vld [vmem:[%s2842_s8] ss:$0 sm:$0xff] }
  0xbd   :  { %1893 = vmatprep.subr.bf16.mxu0 %v2291_v41 }
  0xbe   :  { %1888 = vmatpush3.bf16.msra.mxu1 %v2053_v11 }
  0xbf   :  { %1913 = vmatprep.subr.bf16.mxu1 %v2291_v41 }
 0x172   :  { %v1762_v59 = vpop.f32.mrb[0].mxu0 }
 0x173   :  { %v1763_v61 = vpop.f32.mrb[1].mxu0  ;;  %v1784_v62 = vpop.f32.mrb[0].mxu1 }
 0x174   :  { %v1764_v63 = vadd.f32 %v1763_v61, %v1762_v59  ;;  %v1765_v0 = vpop.f32.mrb[2].mxu0  ;;  %v1785_v1 = vpop.f32.mrb[1].mxu1  ;;  %v2077_v61 = vld [vmem:[#allocation7 + $0x38] sm:$0xff]  }
 0x175   :  { %v1766_v2 = vpop.f32.mrb[3].mxu0  ;;  %v1786_v4 = vadd.f32 %v1785_v1, %v1784_v62  ;;  %v1787_v5 = vpop.f32.mrb[2].mxu1  ;;  %v2078_v62 = vld [vmem:[#allocation9] sm:$0xff]   ;;  %v2080_v0 = vld [vmem:[#allocation9 + $0x10] sm:$0xff]   ;;  %v2081_v1 = vld [vmem:[#allocation9 + $0x18] sm:$0xff]  }
 0x176   :  { %v466_v3 = vadd.f32 %v1764_v63, %v1618_v60  ;;  %v1788_v6 = vpop.f32.mrb[3].mxu1  ;;  %v2076_v60 = vld [vmem:[#allocation7 + $0x30] sm:$0xff]   ;;  %v2079_v63 = vld [vmem:[#allocation9 + $0x8] sm:$0xff]   ;;  %v2082_v2 = vld [vmem:[#allocation9 + $0x20] sm:$0xff]  }
 0x178   :  { %v506_v7 = vadd.f32 %v1786_v4, %v466_v3  ;;  %v2083_v3 = vld [vmem:[#allocation9 + $0x28] sm:$0xff]   ;;  %v1678_v4 = vld [vmem:[%s2844_s10] ss:$0 sm:$0xff] }
 0x17a   :  { %v511_v8 = vmax.f32 %v506_v7, 0.0 }
 0x17c   :  { %v529_v9 = vpack.c.bf16 %v511_v8, %v511_v8 }
 0x17e   :  { %1870 = vmatmul.mubr.bf16.vlgmr.msra.gmra.mrb[4].mxu0 %v529_v9 }
 0x17f   :  { %1909 = vmatprep.mubr.msk.bf16.mxu0 %vm2292_vm0, %v2291_v41  ;;  %1894 = vmatpush3.bf16.msra.mxu0 %v2054_v12  ;;  %v2084_v12 = vld [vmem:[#allocation9 + $0x30] sm:$0xff]  }
 0x180   :  { %1895 = vmatprep.subr.bf16.mxu0 %v2291_v41 }
 0x183   :  { %1896 = vmatpush3.bf16.msra.mxu0 %v2055_v13  ;;  %v2085_v13 = vld [vmem:[#allocation9 + $0x38] sm:$0xff]  }
 0x184   :  { %1897 = vmatprep.subr.bf16.mxu0 %v2291_v41 }
 0x187   :  { %1898 = vmatpush3.bf16.msra.mxu0 %v2056_v14  ;;  %v2086_v14 = vld [vmem:[#allocation10] sm:$0xff]  }
 0x188   :  { %1899 = vmatprep.subr.bf16.mxu0 %v2291_v41 }
 0x18b   :  { %1900 = vmatpush3.bf16.msra.mxu0 %v2057_v15  ;;  %v2087_v15 = vld [vmem:[#allocation10 + $0x8] sm:$0xff]  }
 0x18c   :  { %1901 = vmatprep.subr.bf16.mxu0 %v2291_v41 }
 0x18f   :  { %1902 = vmatpush3.bf16.msra.mxu0 %v2058_v16  ;;  %v2088_v16 = vld [vmem:[#allocation10 + $0x10] sm:$0xff]  }
 0x190   :  { %1903 = vmatprep.subr.bf16.mxu0 %v2291_v41 }
 0x193   :  { %1904 = vmatpush3.bf16.msra.mxu0 %v2059_v17  ;;  %v2089_v17 = vld [vmem:[#allocation10 + $0x18] sm:$0xff]  }
 0x194   :  { %1905 = vmatprep.subr.bf16.mxu0 %v2291_v41 }
 0x197   :  { %1906 = vmatpush3.bf16.msra.mxu0 %v2060_v26 }
 0x198   :  { %1907 = vmatprep.subr.bf16.mxu0 %v2291_v41 }
 0x19b   :  { %1908 = vmatpush3.bf16.msra.mxu0 %v2061_v27 }
 0x19c   :  { %1933 = vmatprep.subr.bf16.mxu0 %v2291_v41 }
 0x251   :  { %v618_v19 = vpop.f32.mrb[4].mxu0 }
 0x252   :  { %v619_v20 = vadd.f32 %v1651_v18, %v618_v19  ;;  %v1871_v21 = vpop.f32.mrb[5].mxu0  ;;  %v2090_v18 = vld [vmem:[#allocation10 + $0x20] sm:$0xff]   ;;  %v2091_v19 = vld [vmem:[#allocation10 + $0x28] sm:$0xff]  }
 0x253   :  { %v621_v22 = vpop.f32.mrb[6].mxu0 }
 0x254   :  { %v624_v23 = vmax.f32 %v619_v20, 0.0  ;;  %v1872_v24 = vpop.f32.mrb[7].mxu0  ;;  %v1687_v20 = vld [vmem:[%s2846_s12] ss:$0 sm:$0xff] }
 0x256   :  { %v642_v25 = vpack.c.bf16 %v624_v23, %v624_v23 }
 0x258   :  { %1890 = vmatmul.mubr.bf16.vlgmr.msra.gmra.mrb[4].mxu1 %v642_v25 }
 0x259   :  { %1929 = vmatprep.mubr.msk.bf16.mxu1 %vm2292_vm0, %v2291_v41  ;;  %1914 = vmatpush3.bf16.msra.mxu1 %v2062_v28  ;;  %v2092_v28 = vld [vmem:[#allocation10 + $0x30] sm:$0xff]  }
 0x25a   :  { %1915 = vmatprep.subr.bf16.mxu1 %v2291_v41 }
 0x25d   :  { %1916 = vmatpush3.bf16.msra.mxu1 %v2063_v29  ;;  %v2093_v29 = vld [vmem:[#allocation10 + $0x38] sm:$0xff]  }
 0x25e   :  { %1917 = vmatprep.subr.bf16.mxu1 %v2291_v41 }
 0x261   :  { %1918 = vmatpush3.bf16.msra.mxu1 %v2064_v31  ;;  %v2094_v31 = vld [vmem:[%s2851_s17] ss:$16 sps:$4 sm:$0xff]  }
 0x262   :  { %1919 = vmatprep.subr.bf16.mxu1 %v2291_v41 }
 0x265   :  { %1920 = vmatpush3.bf16.msra.mxu1 %v2065_v32  ;;  %v2096_v32 = vld [vmem:[%s2851_s17 + $0x4] ss:$16 sps:$4 sm:$0xff]  }
 0x266   :  { %1921 = vmatprep.subr.bf16.mxu1 %v2291_v41 }
 0x269   :  { %1922 = vmatpush3.bf16.msra.mxu1 %v2066_v33  ;;  %v2099_v33 = vld [vmem:[%s2851_s17 + $0xc] ss:$16 sps:$4 sm:$0xff]  }
 0x26a   :  { %1923 = vmatprep.subr.bf16.mxu1 %v2291_v41 }
 0x26d   :  { %1924 = vmatpush3.bf16.msra.mxu1 %v2067_v34  ;;  %v2102_v34 = vld [vmem:[%s2851_s17 + $0x24] ss:$16 sps:$4 sm:$0xff]  }
 0x26e   :  { %1925 = vmatprep.subr.bf16.mxu1 %v2291_v41 }
 0x271   :  { %1926 = vmatpush3.bf16.msra.mxu1 %v2068_v44  ;;  %v2132_v44 = vld [vmem:[%s2851_s17 + $0xc4] ss:$16 sps:$4 sm:$0xff]  }
 0x272   :  { %1927 = vmatprep.subr.bf16.mxu1 %v2291_v41 }
 0x275   :  { %1928 = vmatpush3.bf16.msra.mxu1 %v2069_v45  ;;  %v2130_v45 = vld [vmem:[%s2851_s17 + $0xc0] ss:$16 sps:$4 sm:$0xff]  }
 0x276   :  { %1953 = vmatprep.subr.bf16.mxu1 %v2291_v41 }
 0x32b   :  { %v731_v36 = vpop.f32.mrb[4].mxu1 }
 0x32c   :  { %v732_v37 = vadd.f32 %v1660_v35, %v731_v36  ;;  %v1891_v38 = vpop.f32.mrb[5].mxu1  ;;  %v2108_v35 = vld [vmem:[%s2851_s17 + $0x44] ss:$16 sps:$4 sm:$0xff]   ;;  %v2106_v36 = vld [vmem:[%s2851_s17 + $0x40] ss:$16 sps:$4 sm:$0xff]  }
 0x32d   :  { %v734_v39 = vpop.f32.mrb[6].mxu1  ;;  %v2112_v38 = vld [vmem:[%s2851_s17 + $0x60] ss:$16 sps:$4 sm:$0xff]  }
 0x32e   :  { %v737_v40 = vmax.f32 %v732_v37, 0.0  ;;  %v1892_v42 = vpop.f32.mrb[7].mxu1  ;;  %v2114_v37 = vld [vmem:[%s2851_s17 + $0x64] ss:$16 sps:$4 sm:$0xff]  }
 0x32f   :  { %v2120_v39 = vld [vmem:[%s2851_s17 + $0x84] ss:$16 sps:$4 sm:$0xff]  }
 0x330   :  { %v755_v43 = vpack.c.bf16 %v737_v40, %v737_v40  ;;  %v2118_v40 = vld [vmem:[%s2851_s17 + $0x80] ss:$16 sps:$4 sm:$0xff]   ;;  %v2126_v42 = vld [vmem:[%s2851_s17 + $0xa4] ss:$16 sps:$4 sm:$0xff]  }
 0x332   :  { %1910 = vmatmul.mubr.bf16.vlgmr.msra.gmra.mrb[8].mxu0 %v755_v43  ;;  %v2124_v43 = vld [vmem:[%s2851_s17 + $0xa0] ss:$16 sps:$4 sm:$0xff]  }
 0x333   :  { %1949 = vmatprep.mubr.msk.bf16.mxu0 %vm2292_vm0, %v2291_v41  ;;  %1934 = vmatpush3.bf16.msra.mxu0 %v2070_v46  ;;  %v1696_v46 = vld [vmem:[%s2848_s14] ss:$0 sm:$0xff] }
 0x334   :  { %1935 = vmatprep.subr.bf16.mxu0 %v2291_v41 }
 0x337   :  { %1936 = vmatpush3.bf16.msra.mxu0 %v2071_v47 }
 0x338   :  { %1937 = vmatprep.subr.bf16.mxu0 %v2291_v41 }
 0x33b   :  { %1938 = vmatpush3.bf16.msra.mxu0 %v2072_v48 }
 0x33c   :  { %1939 = vmatprep.subr.bf16.mxu0 %v2291_v41 }
 0x33f   :  { %1940 = vmatpush3.bf16.msra.mxu0 %v2073_v49 }
 0x340   :  { %1941 = vmatprep.subr.bf16.mxu0 %v2291_v41 }
 0x343   :  { %1942 = vmatpush3.bf16.msra.mxu0 %v2074_v50 }
 0x344   :  { %1943 = vmatprep.subr.bf16.mxu0 %v2291_v41 }
 0x347   :  { %1944 = vmatpush3.bf16.msra.mxu0 %v2075_v51 }
 0x348   :  { %1945 = vmatprep.subr.bf16.mxu0 %v2291_v41 }
 0x34b   :  { %1946 = vmatpush3.bf16.msra.mxu0 %v2076_v60  ;;  %v2115_v60 = vld [vmem:[%s2851_s17 + $0x68] ss:$16 sps:$4 sm:$0xff]  }
 0x34c   :  { %1947 = vmatprep.subr.bf16.mxu0 %v2291_v41 }
 0x34f   :  { %1948 = vmatpush3.bf16.msra.mxu0 %v2077_v61  ;;  %v2123_v61 = vld [vmem:[%s2851_s17 + $0x8c] ss:$16 sps:$4 sm:$0xff]  }
 0x350   :  { %1973 = vmatprep.subr.bf16.mxu0 %v2291_v41 }
 0x405   :  { %v844_v53 = vpop.f32.mrb[8].mxu0 }
 0x406   :  { %v845_v54 = vadd.f32 %v1669_v52, %v844_v53  ;;  %v1911_v55 = vpop.f32.mrb[9].mxu0  ;;  %v2097_v53 = vld [vmem:[%s2851_s17 + $0x8] ss:$16 sps:$4 sm:$0xff]  }
 0x407   :  { %v847_v56 = vpop.f32.mrb[10].mxu0  ;;  %v2105_v55 = vld [vmem:[%s2851_s17 + $0x2c] ss:$16 sps:$4 sm:$0xff]  }
 0x408   :  { %v850_v57 = vmax.f32 %v845_v54, 0.0  ;;  %v1912_v58 = vpop.f32.mrb[11].mxu0  ;;  %v2103_v56 = vld [vmem:[%s2851_s17 + $0x28] ss:$16 sps:$4 sm:$0xff]  }
 0x409   :  { %v2109_v58 = vld [vmem:[%s2851_s17 + $0x48] ss:$16 sps:$4 sm:$0xff]  }
 0x40a   :  { %v868_v59 = vpack.c.bf16 %v850_v57, %v850_v57  ;;  %v2111_v57 = vld [vmem:[%s2851_s17 + $0x4c] ss:$16 sps:$4 sm:$0xff]  }
 0x40c   :  { %1930 = vmatmul.mubr.bf16.vlgmr.msra.gmra.mrb[8].mxu1 %v868_v59  ;;  %v2117_v59 = vld [vmem:[%s2851_s17 + $0x6c] ss:$16 sps:$4 sm:$0xff]  }
 0x40d   :  { %1969 = vmatprep.mubr.msk.bf16.mxu1 %vm2292_vm0, %v2291_v41  ;;  %1954 = vmatpush3.bf16.msra.mxu1 %v2078_v62  ;;  %v2121_v62 = vld [vmem:[%s2851_s17 + $0x88] ss:$16 sps:$4 sm:$0xff]  }
 0x40e   :  { %1955 = vmatprep.subr.bf16.mxu1 %v2291_v41 }
 0x411   :  { %1956 = vmatpush3.bf16.msra.mxu1 %v2079_v63  ;;  %v2129_v63 = vld [vmem:[%s2851_s17 + $0xac] ss:$16 sps:$4 sm:$0xff]  }
 0x412   :  { %1957 = vmatprep.subr.bf16.mxu1 %v2291_v41 }
 0x415   :  { %1958 = vmatpush3.bf16.msra.mxu1 %v2080_v0  ;;  %v2127_v0 = vld [vmem:[%s2851_s17 + $0xa8] ss:$16 sps:$4 sm:$0xff]  }
 0x416   :  { %1959 = vmatprep.subr.bf16.mxu1 %v2291_v41 }
 0x419   :  { %1960 = vmatpush3.bf16.msra.mxu1 %v2081_v1  ;;  %v2135_v1 = vld [vmem:[%s2851_s17 + $0xcc] ss:$16 sps:$4 sm:$0xff]  }
 0x41a   :  { %1961 = vmatprep.subr.bf16.mxu1 %v2291_v41 }
 0x41d   :  { %1962 = vmatpush3.bf16.msra.mxu1 %v2082_v2  ;;  %v2133_v2 = vld [vmem:[%s2851_s17 + $0xc8] ss:$16 sps:$4 sm:$0xff]  }
 0x41e   :  { %1963 = vmatprep.subr.bf16.mxu1 %v2291_v41 }
 0x421   :  { %1964 = vmatpush3.bf16.msra.mxu1 %v2083_v3  ;;  %v2138_v3 = vld [vmem:[%s2851_s17 + $0xe4] ss:$16 sps:$4 sm:$0xff]  }
 0x422   :  { %1965 = vmatprep.subr.bf16.mxu1 %v2291_v41 }
 0x425   :  { %1966 = vmatpush3.bf16.msra.mxu1 %v2084_v12 }
 0x426   :  { %1967 = vmatprep.subr.bf16.mxu1 %v2291_v41 }
 0x429   :  { %1968 = vmatpush3.bf16.msra.mxu1 %v2085_v13 }
 0x42a   :  { %1518 = vmatprep.subr.bf16.mxu1 %v2096_v32 }
 0x4df   :  { %v957_v5 = vpop.f32.mrb[8].mxu1 }
 0x4e0   :  { %v958_v6 = vadd.f32 %v1678_v4, %v957_v5  ;;  %v1931_v7 = vpop.f32.mrb[9].mxu1  ;;  %v2141_v4 = vld [vmem:[%s2851_s17 + $0xec] ss:$16 sps:$4 sm:$0xff]   ;;  %v2136_v5 = vld [vmem:[%s2851_s17 + $0xe0] ss:$16 sps:$4 sm:$0xff]  }
 0x4e1   :  { %v960_v8 = vpop.f32.mrb[10].mxu1  ;;  %v2293_v7 = vmov 0  }
 0x4e2   :  { %v963_v9 = vmax.f32 %v958_v6, 0.0  ;;  %v1932_v10 = vpop.f32.mrb[11].mxu1  ;;  %v2139_v6 = vld [vmem:[%s2851_s17 + $0xe8] ss:$16 sps:$4 sm:$0xff]   ;;  %v1705_v8 = vld [vmem:[%s2850_s16] ss:$0 sm:$0xff] }
 0x4e4   :  { %v981_v11 = vpack.c.bf16 %v963_v9, %v963_v9 }
 0x4e6   :  { %1950 = vmatmul.mubr.bf16.vlgmr.msra.gmra.mrb[12].mxu0 %v981_v11 }
 0x4e7   :  { %1989 = vmatprep.mubr.msk.bf16.mxu0 %vm2292_vm0, %v2291_v41  ;;  %1974 = vmatpush3.bf16.msra.mxu0 %v2086_v14 }
 0x4e8   :  { %1975 = vmatprep.subr.bf16.mxu0 %v2291_v41 }
 0x4eb   :  { %1976 = vmatpush3.bf16.msra.mxu0 %v2087_v15 }
 0x4ec   :  { %1977 = vmatprep.subr.bf16.mxu0 %v2291_v41 }
 0x4ef   :  { %1978 = vmatpush3.bf16.msra.mxu0 %v2088_v16  ;;  %v1340_v16 = vsub.s32 0, %v2583_v30 }
 0x4f0   :  { %1979 = vmatprep.subr.bf16.mxu0 %v2291_v41 }
 0x4f3   :  { %1980 = vmatpush3.bf16.msra.mxu0 %v2089_v17  ;;  %v1348_v17 = vsub.s32 2, %v2583_v30 }
 0x4f4   :  { %1981 = vmatprep.subr.bf16.mxu0 %v2291_v41 }
 0x4f7   :  { %1982 = vmatpush3.bf16.msra.mxu0 %v2090_v18  ;;  %v1335_v18 = vld [vmem:[%s2852_s18] sm:$0xf] }
 0x4f8   :  { %1983 = vmatprep.subr.bf16.mxu0 %v2291_v41 }
 0x4fb   :  { %1984 = vmatpush3.bf16.msra.mxu0 %v2091_v19  ;;  %v1344_v19 = vsub.s32 1, %v2583_v30 }
 0x4fc   :  { %1985 = vmatprep.subr.bf16.mxu0 %v2291_v41 }
 0x4ff   :  { %1986 = vmatpush3.bf16.msra.mxu0 %v2092_v28 }
 0x500   :  { %1987 = vmatprep.subr.bf16.mxu0 %v2291_v41  ;;  %v2100_v41 = vld [vmem:[%s2851_s17 + $0x20] ss:$16 sps:$4 sm:$0xff]  }
 0x503   :  { %1988 = vmatpush3.bf16.msra.mxu0 %v2093_v29 }
 0x504   :  { %1559 = vmatprep.subr.bf16.mxu0 %v2099_v33 }
 0x5b9   :  { %v1070_v21 = vpop.f32.mrb[12].mxu0 }
 0x5ba   :  { %v1071_v22 = vadd.f32 %v1687_v20, %v1070_v21  ;;  %v1951_v23 = vpop.f32.mrb[13].mxu0  ;;  %v1352_v20 = vsub.s32 3, %v2583_v30  ;;  %v1341_v21 = vrot.slane %v1335_v18, %v1340_v16 }
 0x5bb   :  { %v1073_v24 = vpop.f32.mrb[14].mxu0  ;;  %v1345_v23 = vrot.slane %v1335_v18, %v1344_v19 }
 0x5bc   :  { %v1076_v25 = vmax.f32 %v1071_v22, 0.0  ;;  %v1952_v26 = vpop.f32.mrb[15].mxu0  ;;  %v1349_v22 = vrot.slane %v1335_v18, %v1348_v17  ;;  %v1353_v24 = vrot.slane %v1335_v18, %v1352_v20 }
 0x5be   :  { %v1094_v27 = vpack.c.bf16 %v1076_v25, %v1076_v25 }
 0x5c0   :  { %1970 = vmatmul.mubr.bf16.vlgmr.msra.gmra.mrb[12].mxu1 %v1094_v27 }
 0x5c1   :  { %1519 = vmatpush1.bf16.msra.mxu1 %v2094_v31  ;;  %1550 = vmatprep.mubr.bf16.mxu1 %v2293_v7 }
 0x5c2   :  { %1520 = vmatprep.subr.bf16.mxu1 %v2102_v34 }
 0x5c5   :  { %1521 = vmatpush1.bf16.msra.mxu1 %v2100_v41 }
 0x5c6   :  { %1522 = vmatprep.subr.bf16.mxu1 %v2108_v35 }
 0x5c9   :  { %1523 = vmatpush1.bf16.msra.mxu1 %v2106_v36 }
 0x5ca   :  { %1524 = vmatprep.subr.bf16.mxu1 %v2114_v37 }
 0x5cd   :  { %1525 = vmatpush1.bf16.msra.mxu1 %v2112_v38 }
 0x5ce   :  { %1526 = vmatprep.subr.bf16.mxu1 %v2120_v39 }
 0x5d1   :  { %1527 = vmatpush1.bf16.msra.mxu1 %v2118_v40 }
 0x5d2   :  { %1528 = vmatprep.subr.bf16.mxu1 %v2126_v42 }
 0x5d5   :  { %1529 = vmatpush1.bf16.msra.mxu1 %v2124_v43 }
 0x5d6   :  { %1530 = vmatprep.subr.bf16.mxu1 %v2132_v44 }
 0x5d9   :  { %1531 = vmatpush1.bf16.msra.mxu1 %v2130_v45 }
 0x5da   :  { %1532 = vmatprep.subr.bf16.mxu1 %v2138_v3 }
 0x5dd   :  { %1533 = vmatpush1.bf16.msra.mxu1 %v2136_v5 }
 0x693   :  { %v1183_v47 = vpop.f32.mrb[12].mxu1 }
 0x694   :  { %v1184_v48 = vadd.f32 %v1696_v46, %v1183_v47  ;;  %v1971_v49 = vpop.f32.mrb[13].mxu1 }
 0x695   :  { %v1186_v50 = vpop.f32.mrb[14].mxu1 }
 0x696   :  { %v1189_v51 = vmax.f32 %v1184_v48, 0.0  ;;  %v1972_v52 = vpop.f32.mrb[15].mxu1 }
 0x698   :  { %v1207_v54 = vpack.c.bf16 %v1189_v51, %v1189_v51 }
 0x69a   :  { %1990 = vmatmul.mubr.bf16.vlgmr.msra.gmra.mrb[16].mxu0 %v1207_v54 }
 0x69b   :  { %1560 = vmatpush1.bf16.msra.mxu0 %v2097_v53  ;;  %1591 = vmatprep.mubr.bf16.mxu0 %v2293_v7 }
 0x69c   :  { %1561 = vmatprep.subr.bf16.mxu0 %v2105_v55 }
 0x69f   :  { %1562 = vmatpush1.bf16.msra.mxu0 %v2103_v56 }
 0x6a0   :  { %1563 = vmatprep.subr.bf16.mxu0 %v2111_v57 }
 0x6a3   :  { %1564 = vmatpush1.bf16.msra.mxu0 %v2109_v58 }
 0x6a4   :  { %1565 = vmatprep.subr.bf16.mxu0 %v2117_v59 }
 0x6a7   :  { %1566 = vmatpush1.bf16.msra.mxu0 %v2115_v60 }
 0x6a8   :  { %1567 = vmatprep.subr.bf16.mxu0 %v2123_v61 }
 0x6ab   :  { %1568 = vmatpush1.bf16.msra.mxu0 %v2121_v62 }
 0x6ac   :  { %1569 = vmatprep.subr.bf16.mxu0 %v2129_v63 }
 0x6af   :  { %1570 = vmatpush1.bf16.msra.mxu0 %v2127_v0 }
 0x6b0   :  { %1571 = vmatprep.subr.bf16.mxu0 %v2135_v1 }
 0x6b3   :  { %1572 = vmatpush1.bf16.msra.mxu0 %v2133_v2 }
 0x6b4   :  { %1573 = vmatprep.subr.bf16.mxu0 %v2141_v4 }
 0x6b7   :  { %1574 = vmatpush1.bf16.msra.mxu0 %v2139_v6 }
 0x76d   :  { %v1296_v9 = vpop.f32.mrb[16].mxu0 }
 0x76e   :  { %v1297_v10 = vadd.f32 %v1705_v8, %v1296_v9  ;;  %v1991_v11 = vpop.f32.mrb[17].mxu0 }
 0x76f   :  { %v1299_v12 = vpop.f32.mrb[18].mxu0 }
 0x770   :  { %v1302_v13 = vmax.f32 %v1297_v10, 0.0  ;;  %v1992_v14 = vpop.f32.mrb[19].mxu0 }
 0x772   :  { %v1336_v15 = vpack.c.bf16 %v1302_v13, %v1302_v13 }
 0x774   :  { %1551 = vmatmul.mubr.bf16.vlgmr.msra.gmra.mrb[16].mxu1 %v1336_v15  ;;  %1592 = vmatmul.mubr.bf16.vlgmr.msra.gmra.mrb[20].mxu0 %v1336_v15 }
 0x847   :  { %v1552_v25 = vpop.f32.mrb[16].mxu1  ;;  %v1593_v26 = vpop.f32.mrb[20].mxu0 }
 0x848   :  { %v1553_v27 = vadd.f32 %v1552_v25, %v1341_v21  ;;  %v1594_v28 = vadd.f32 %v1593_v26, %v1349_v22  ;;  %v1554_v29 = vpop.f32.mrb[17].mxu1  ;;  %v1595_v31 = vpop.f32.mrb[21].mxu0 }
 0x849   :  { %v1555_v32 = vadd.f32 %v1554_v29, %v1345_v23  ;;  %v1596_v33 = vadd.f32 %v1595_v31, %v1353_v24  ;;  %v1556_v34 = vpop.f32.mrb[18].mxu1  ;;  %v1597_v41 = vpop.f32.mrb[22].mxu0 }
 0x84a   :  { %v1557_v35 = vpop.f32.mrb[19].mxu1  ;;  %v1598_v36 = vpop.f32.mrb[23].mxu0 }
 0x84b   :  { %v1604_v37 = vcombine.low %v1553_v27, %v1555_v32  ;;  %v1605_v38 = vcombine.low %v1594_v28, %v1596_v33 }
 0x84d   :  { %1608 = vst [vmem:[%s2866_s0] sm:$0xff] %v1604_v37  ;;  %1609 = vst [vmem:[%s2866_s0 + $0x8] sm:$0xff] %v1605_v38 }
 0x84e   :  { %1614 = vsyncpa [#allocation3], 1 }
 0x84f   :  { %1615 = vsyncpa [#allocation5], 1 }
 0x850   :  { %1616 = vsyncpa [#allocation8], 1 }
 0x851   :  { %1617 = vsyncpa [#allocation11], 1 }

</bundles_post_ra>
